<compile_context>
chip_gen: v7x
topology: tpu7x:2x2x1
jax: 0.10.0
libtpu: 0.0.40
codegen_flags: <defaults>
</compile_context>

<pallas_src>
import functools

import jax
import jax.numpy as jnp
from jax.experimental import pallas as pl
from jax.experimental.pallas import tpu as pltpu

ALPHA = 0.15780446819040916
GAMMA = 1.9048515912023805


def _round_up(x, m):
    return ((x + m - 1) // m) * m


def _chip_defaults():
    """(num_partials, max_tile_rows) per chip generation."""
    kind = ""
    try:
        kind = jax.devices()[0].device_kind.lower()
    except Exception:
        pass
    if "v7" in kind:
        # 2 TensorCores per chip -> 2-way "parallel" split; 2 MiB input blocks.
        return 2, 1024
    # v5e / v6e (and anything unknown): single TensorCore, 1 MiB input blocks.
    return 1, 512


def _focal_loss_kernel(inp_ref, tgt_ref, acc_ref, *, alpha, gamma, hard_labels):
    k = pl.program_id(1)

    @pl.when(k == 0)
    def _init():
        acc_ref[...] = jnp.zeros_like(acc_ref)

    p = inp_ref[...].astype(jnp.float32)
    t = tgt_ref[...].astype(jnp.float32)

    # BCELoss(reduction='none') log terms, with PyTorch's clamp at -100.
    log_p = jnp.maximum(jnp.log(p), -100.0)
    log_1mp = jnp.maximum(jnp.log(1.0 - p), -100.0)

    if hard_labels:
        # t in {0,1}:  bce = -log(p) if t==1 else -log(1-p)
        #              pt  = exp(-bce)  =>  1-pt = (1-p) if t==1 else p
        # so log(1-pt) reuses the other log -- 3 transcendentals per element.
        t_is_one = t > 0.5
        bce = -jnp.where(t_is_one, log_p, log_1mp)
        log_one_minus_pt = jnp.where(t_is_one, log_1mp, log_p)
        focal = alpha * jnp.exp(gamma * log_one_minus_pt) * bce
    else:
        # General (soft-label) path: 5 transcendentals per element.
        bce = -(t * log_p + (1.0 - t) * log_1mp)
        pt = jnp.exp(-bce)
        one_minus_pt = jnp.maximum(1.0 - pt, 0.0)
        # (1 - pt) ** gamma written as exp(gamma * log(.)); log(0) -> -inf,
        # exp(-inf) -> 0, matching 0**gamma for gamma > 0.
        focal = alpha * jnp.exp(gamma * jnp.log(one_minus_pt)) * bce

    # Output block is resident across the (arbitrary) k axis -> vector accumulator.
    acc_ref[...] += focal


def focal_loss(inputs, targets, *, alpha=ALPHA, gamma=GAMMA, hard_labels=True,
               cols=512, max_tile_rows=None, num_partials=None):
    """Mean focal loss.  `hard_labels=True` assumes targets in {0, 1} (exact,
    fewer transcendentals + bf16 target traffic); use False for soft targets."""
    assert inputs.shape == targets.shape
    n = int(inputs.size)
    assert n > 0

    chip_partials, chip_tile_rows = _chip_defaults()
    if num_partials is None:
        num_partials = chip_partials
    if max_tile_rows is None:
        max_tile_rows = chip_tile_rows

    # Tile sizing: bound padding waste and keep both partials fed with real rows.
    rows_needed = -(-n // cols)
    tile_rows = min(max_tile_rows,
                    _round_up(max(-(-rows_needed // num_partials), 1), 8))
    tiles_per_partial = max(1, -(-rows_needed // (tile_rows * num_partials)))
    rows_padded = num_partials * tiles_per_partial * tile_rows
    padded_n = rows_padded * cols

    x = inputs.reshape(-1)
    t = targets.reshape(-1)
    if hard_labels:
        # Binary labels are exact in bf16 -> halves target HBM traffic.
        t = t.astype(jnp.bfloat16)
    if padded_n != n:
        # Zero-contribution padding: p=0, t=0 gives focal == 0 exactly in both
        # paths, so no in-kernel masking is needed and the mean stays exact.
        pad = padded_n - n
        x = jnp.pad(x, (0, pad))
        t = jnp.pad(t, (0, pad))
    x2 = x.reshape(rows_padded, cols)
    t2 = t.reshape(rows_padded, cols)

    kernel = functools.partial(
        _focal_loss_kernel,
        alpha=float(alpha), gamma=float(gamma), hard_labels=bool(hard_labels),
    )

    partial_sums = pl.pallas_call(
        kernel,
        out_shape=jax.ShapeDtypeStruct((num_partials * tile_rows, cols),
                                       jnp.float32),
        grid_spec=pltpu.PrefetchScalarGridSpec(
            num_scalar_prefetch=0,
            grid=(num_partials, tiles_per_partial),
            in_specs=[
                pl.BlockSpec((tile_rows, cols),
                             lambda p, k: (p * tiles_per_partial + k, 0)),
                pl.BlockSpec((tile_rows, cols),
                             lambda p, k: (p * tiles_per_partial + k, 0)),
            ],
            out_specs=pl.BlockSpec((tile_rows, cols), lambda p, k: (p, 0)),
        ),
        compiler_params=pltpu.CompilerParams(
            dimension_semantics=("parallel", "arbitrary"),
        ),
    )(x2, t2)

    # Single cheap XLA reduction over the per-partial vector accumulators.
    return (jnp.sum(partial_sums) / jnp.float32(n)).astype(jnp.float32)


def _focal_loss_ref(inputs, targets, alpha=ALPHA, gamma=GAMMA):
    p = inputs.astype(jnp.float32)
    t = targets.astype(jnp.float32)
    bce = -(t * jnp.maximum(jnp.log(p), -100.0)
            + (1.0 - t) * jnp.maximum(jnp.log(1.0 - p), -100.0))
    pt = jnp.exp(-bce)
    return jnp.mean(alpha * jnp.power(1.0 - pt, gamma) * bce)


if __name__ == "__main__":
    key = jax.random.PRNGKey(0)
    k1, k2 = jax.random.split(key)

    # Small NCHW-like shape; FocalLoss itself is shape-agnostic elementwise.
    shape = (2, 4, 16, 16)
    logits = jax.random.normal(k1, shape, dtype=jnp.float32)
    inputs = jax.nn.sigmoid(logits)                        # probabilities in (0,1)
    targets = jax.random.bernoulli(k2, 0.3, shape).astype(jnp.float32)

    ref = jax.block_until_ready(_focal_loss_ref(inputs, targets))

    # Hard-label fast path (3 transcendentals/elem, bf16 targets).
    out_hard = jax.block_until_ready(focal_loss(inputs, targets))
    assert jnp.allclose(out_hard, ref, rtol=1e-5, atol=1e-6), (out_hard, ref)

    # General soft-label path (keeps exact BCELoss semantics for non-binary t).
    out_soft = jax.block_until_ready(focal_loss(inputs, targets,
                                                hard_labels=False))
    assert jnp.allclose(out_soft, ref, rtol=1e-5, atol=1e-6), (out_soft, ref)

    print("KERNEL_OK")
</pallas_src>

<mosaic_0001>
module attributes {stable_mosaic.version = 11 : i64} {
  func.func @_focal_loss_kernel(%arg0: i32, %arg1: i32, %arg2: memref<8x512xf32, #tpu.memory_space<vmem>>, %arg3: memref<8x512xbf16, #tpu.memory_space<vmem>>, %arg4: memref<8x512xf32, #tpu.memory_space<vmem>>) attributes {dimension_semantics = [#tpu.dimension_semantics<parallel>, #tpu.dimension_semantics<arbitrary>], iteration_bounds = array<i64: 1, 1>, scalar_prefetch = 0 : i64, scratch_operands = 0 : i64, tpu.core_type = #tpu.core_type<tc>, window_params = [{transform_indices = @transform_0, window_bounds = array<i64: 8, 512>}, {transform_indices = @transform_1, window_bounds = array<i64: 8, 512>}, {transform_indices = @transform_2, window_bounds = array<i64: 8, 512>}]} {
    %c0_i32 = arith.constant 0 : i32
    %0 = arith.cmpi eq, %arg1, %c0_i32 : i32
    %1 = arith.extui %0 : i1 to i32
    %c0_i32_0 = arith.constant 0 : i32
    %2 = arith.cmpi ne, %1, %c0_i32_0 : i32
    scf.if %2 {
      %cst_14 = arith.constant 0.000000e+00 : f32
      %29 = vector.broadcast %cst_14 : f32 to vector<8x512xf32>
      %c0_15 = arith.constant 0 : index
      %c0_16 = arith.constant 0 : index
      %30 = vector.load %arg4[%c0_15, %c0_16] : memref<8x512xf32, #tpu.memory_space<vmem>>, vector<8x512xf32>
      tpu.vector_store %arg4[%c0_15, %c0_16], %29 {strides = array<i32>} : memref<8x512xf32, #tpu.memory_space<vmem>>, vector<8x512xf32>,
    } else {
    }
    %c0 = arith.constant 0 : index
    %c0_1 = arith.constant 0 : index
    %3 = vector.load %arg2[%c0, %c0_1] : memref<8x512xf32, #tpu.memory_space<vmem>>, vector<8x512xf32>
    %c0_2 = arith.constant 0 : index
    %c0_3 = arith.constant 0 : index
    %4 = vector.load %arg3[%c0_2, %c0_3] : memref<8x512xbf16, #tpu.memory_space<vmem>>, vector<8x512xbf16>
    %5 = arith.extf %4 : vector<8x512xbf16> to vector<8x512xf32>
    %6 = math.log %3 : vector<8x512xf32>
    %cst = arith.constant -1.000000e+02 : f32
    %7 = vector.broadcast %cst : f32 to vector<8x512xf32>
    %8 = arith.maximumf %6, %7 : vector<8x512xf32>
    %cst_4 = arith.constant 1.000000e+00 : f32
    %9 = vector.broadcast %cst_4 : f32 to vector<8x512xf32>
    %10 = arith.subf %9, %3 : vector<8x512xf32>
    %11 = math.log %10 : vector<8x512xf32>
    %cst_5 = arith.constant -1.000000e+02 : f32
    %12 = vector.broadcast %cst_5 : f32 to vector<8x512xf32>
    %13 = arith.maximumf %11, %12 : vector<8x512xf32>
    %cst_6 = arith.constant 5.000000e-01 : f32
    %14 = vector.broadcast %cst_6 : f32 to vector<8x512xf32>
    %15 = arith.cmpf ogt, %5, %14 : vector<8x512xf32>
    %16 = arith.select %15, %8, %13 : vector<8x512xi1>, vector<8x512xf32>
    %cst_7 = arith.constant 0.000000e+00 : f32
    %17 = vector.broadcast %cst_7 : f32 to vector<8x512xf32>
    %18 = arith.subf %17, %16 : vector<8x512xf32>
    %19 = arith.select %15, %13, %8 : vector<8x512xi1>, vector<8x512xf32>
    %cst_8 = arith.constant 1.90485156 : f32
    %20 = vector.broadcast %cst_8 : f32 to vector<8x512xf32>
    %21 = arith.mulf %20, %19 : vector<8x512xf32>
    %22 = math.exp %21 : vector<8x512xf32>
    %cst_9 = arith.constant 0.157804474 : f32
    %23 = vector.broadcast %cst_9 : f32 to vector<8x512xf32>
    %24 = arith.mulf %23, %22 : vector<8x512xf32>
    %25 = arith.mulf %24, %18 : vector<8x512xf32>
    %c0_10 = arith.constant 0 : index
    %c0_11 = arith.constant 0 : index
    %26 = vector.load %arg4[%c0_10, %c0_11] : memref<8x512xf32, #tpu.memory_space<vmem>>, vector<8x512xf32>
    %27 = arith.addf %26, %25 : vector<8x512xf32>
    %c0_12 = arith.constant 0 : index
    %c0_13 = arith.constant 0 : index
    %28 = vector.load %arg4[%c0_12, %c0_13] : memref<8x512xf32, #tpu.memory_space<vmem>>, vector<8x512xf32>
    tpu.vector_store %arg4[%c0_12, %c0_13], %27 {strides = array<i32>} : memref<8x512xf32, #tpu.memory_space<vmem>>, vector<8x512xf32>,
    return
  }
  func.func @transform_0(%arg0: i32, %arg1: i32) -> (i32, i32) {
    %c1_i32 = arith.constant 1 : i32
    %0 = arith.muli %arg0, %c1_i32 : i32
    %1 = arith.addi %0, %arg1 : i32
    %c0_i32 = arith.constant 0 : i32
    %c0_i32_0 = arith.constant 0 : i32
    return %1, %c0_i32 : i32, i32
  }
  func.func @transform_1(%arg0: i32, %arg1: i32) -> (i32, i32) {
    %c1_i32 = arith.constant 1 : i32
    %0 = arith.muli %arg0, %c1_i32 : i32
    %1 = arith.addi %0, %arg1 : i32
    %c0_i32 = arith.constant 0 : i32
    %c0_i32_0 = arith.constant 0 : i32
    return %1, %c0_i32 : i32, i32
  }
  func.func @transform_2(%arg0: i32, %arg1: i32) -> (i32, i32) {
    %c0_i32 = arith.constant 0 : i32
    %c0_i32_0 = arith.constant 0 : i32
    return %arg0, %c0_i32 : i32, i32
  }
}

</mosaic_0001>

<bundles_post_ra>
// kernel: tpu_custom_call.1
= control target key start
LH: loop header
LB: loop body
LE: loop exit
PB: predicated region body
PF: predicated region fallthrough
CT: control target
= control target key end

     0   :  { %7 = vsyncpa [#allocation3], 0  ;;  %s342_s0 = inlined_call_operand.hbm [shape: f32[8,512], index: 0, kind: input, shape index: {}]   ;;  %s343_s1 = inlined_call_operand.hbm [shape: bf16[8,512], index: 1, kind: input, shape index: {}]   ;;  %s344_s2 = inlined_call_operand.hbm [shape: f32[8,512], index: 2, kind: output, shape index: {}]  }
   0x1   :  { %8 = vsyncpa [#allocation6], 0 }
   0x2   :  { %9 = vsyncpa [#allocation4], 0  ;;  %s256_s9 = smov [#allocation2]   ;;  %s257_s11 = smov [#allocation5]  }
   0x3   :  { %s20_s10 = sshll.u32 %s256_s9, 4  ;;  %s34_s12 = sshll.u32 %s257_s11, 4  ;;  %s21_s10 = int_to_ptr.vmem [resolvable:$true] %s20_s10  ;;  %s35_s12 = int_to_ptr.vmem [resolvable:$true] %s34_s12 }
   0x4   :  { %s184_s15 = scalar_lea.hbm %s342_s0, 512 }
   0x5   :  { %p185_p0 = scmp.ne.s32.totalorder %s342_s0, %s184_s15  ;;  %p188_p1 = scmp.lt.u32.totalorder %s184_s15, %s342_s0 }
   0x7   :  { %p190_p2 = pnand %p188_p1, %p185_p0 }
   0x9   :  { %193 = shalt.err (!%p190_p2)
}
   0xa   :  { %s194_s20 = scalar_lea.vmem %s21_s10, 512  ;;  %p199_p4 = scmp.lt.s32.totalorder %s21_s10, %s21_s10 }
   0xb   :  { %p195_p3 = scmp.ne.s32.totalorder %s21_s10, %s194_s20  ;;  %p200_p5 = scmp.lt.s32.totalorder %s194_s20, %s194_s20 }
   0xd   :  { %p201_p6 = por %p200_p5, %p199_p4 }
   0xf   :  { %p202_p7 = pnand %p201_p6, %p195_p3 }
  0x11   :  { %205 = shalt.err (!%p202_p7)
}
  0x12   :  { %23 = dma.hbm_to_vmem [thread:$0]  %s342_s0, 512, %s21_s10, [#allocation3]  }
  0x13   :  { %s206_s25 = scalar_lea.hbm %s343_s1, 256 }
  0x14   :  { %p207_p8 = scmp.ne.s32.totalorder %s343_s1, %s206_s25  ;;  %p210_p9 = scmp.lt.u32.totalorder %s206_s25, %s343_s1 }
  0x16   :  { %p212_p10 = pnand %p210_p9, %p207_p8 }
  0x18   :  { %215 = shalt.err (!%p212_p10)
}
  0x19   :  { %s216_s30 = scalar_lea.vmem %s35_s12, 256  ;;  %p221_p12 = scmp.lt.s32.totalorder %s35_s12, %s35_s12 }
  0x1a   :  { %p217_p11 = scmp.ne.s32.totalorder %s35_s12, %s216_s30  ;;  %p222_p13 = scmp.lt.s32.totalorder %s216_s30, %s216_s30 }
  0x1c   :  { %p223_p0 = por %p222_p13, %p221_p12 }
  0x1e   :  { %p224_p1 = pnand %p223_p0, %p217_p11 }
  0x20   :  { %227 = shalt.err (!%p224_p1)
}
  0x21   :  { %37 = dma.hbm_to_vmem [thread:$0]  %s343_s1, 256, %s35_s12, [#allocation6]  }
  0x22   :  { %250 = dma.done.wait [#allocation3], 512  }
  0x23   :  { %251 = vsyncadd [#allocation3], 4294966784 }
  0x24   :  { %252 = dma.done.wait [#allocation6], 256  }
  0x25   :  { %253 = vsyncadd [#allocation6], 4294967040  ;;  %v54_v0 = vld [vmem:[#allocation2] sm:$0xff]  ;;  %v55_v1 = vld [vmem:[#allocation2 + $0x8] sm:$0xff]  ;;  %s258_s1 = smov [#allocation7]  }
  0x26   :  { %160 = vlog2.f32 %v54_v0  ;;  %v76_v2 = vsub.f32 1.0, %v54_v0  ;;  %v56_v3 = vld [vmem:[#allocation2 + $0x10] sm:$0xff]  ;;  %v57_v4 = vld [vmem:[#allocation2 + $0x18] sm:$0xff]  ;;  %v77_v5 = vsub.f32 1.0, %v55_v1  ;;  %v58_v8 = vld [vmem:[#allocation5] sm:$0xff]  ;;  %s146_s4 = sshll.u32 %s258_s1, 4  ;;  %s147_s4 = int_to_ptr.vmem [resolvable:$true] %s146_s4 }
  0x27   :  { %162 = vlog2.f32 %v55_v1  ;;  %v78_v6 = vsub.f32 1.0, %v56_v3  ;;  %v79_v7 = vsub.f32 1.0, %v57_v4  ;;  %v60_v10 = vunpack.c.l.bf16 %v58_v8  ;;  %v59_v14 = vld [vmem:[#allocation5 + $0x8] sm:$0xff]  ;;  %s228_s5 = scalar_lea.vmem %s147_s4, 512  ;;  %p233_p3 = scmp.lt.s32.totalorder %s147_s4, %s147_s4 }
  0x28   :  { %164 = vlog2.f32 %v76_v2  ;;  %v61_v13 = vunpack.c.h.bf16 %v58_v8  ;;  %v62_v24 = vunpack.c.l.bf16 %v59_v14  ;;  %v63_v35 = vunpack.c.h.bf16 %v59_v14  ;;  %p229_p2 = scmp.ne.s32.totalorder %s147_s4, %s228_s5  ;;  %p234_p4 = scmp.lt.s32.totalorder %s228_s5, %s228_s5 }
  0x29   :  { %166 = vlog2.f32 %v77_v5  ;;  %vm298_vm0 = vcmp.gt.f32.partialorder %v60_v10, 0.5 }
  0x2a   :  { %168 = vlog2.f32 %v56_v3  ;;  %vm302_vm1 = vcmp.gt.f32.partialorder %v61_v13, 0.5  ;;  %vm310_vm2 = vcmp.gt.f32.partialorder %v62_v24, 0.5  ;;  %vm316_vm3 = vcmp.gt.f32.partialorder %v63_v35, 0.5  ;;  %p235_p5 = por %p234_p4, %p233_p3 }
  0x2b   :  { %170 = vlog2.f32 %v78_v6 }
  0x2c   :  { %172 = vlog2.f32 %v57_v4  ;;  %p236_p6 = pnand %p235_p5, %p229_p2 }
  0x2d   :  { %174 = vlog2.f32 %v79_v7 }
  0x30   :  { %v161_v9 = vpop.eup %160 }
  0x31   :  { %v163_v11 = vpop.eup %162  ;;  %v65_v12 = vmul.f32 0.6931472, %v161_v9 }
  0x32   :  { %v165_v15 = vpop.eup %164  ;;  %v67_v16 = vmul.f32 0.6931472, %v163_v11 }
  0x33   :  { %v167_v17 = vpop.eup %166  ;;  %v72_v18 = vmax.f32 %v65_v12, -100.0  ;;  %v81_v19 = vmul.f32 0.6931472, %v165_v15 }
  0x34   :  { %v169_v20 = vpop.eup %168  ;;  %v73_v22 = vmax.f32 %v67_v16, -100.0  ;;  %v83_v23 = vmul.f32 0.6931472, %v167_v17 }
  0x35   :  { %v171_v25 = vpop.eup %170  ;;  %v88_v26 = vmax.f32 %v81_v19, -100.0  ;;  %v69_v28 = vmul.f32 0.6931472, %v169_v20 }
  0x36   :  { %v173_v29 = vpop.eup %172  ;;  %v89_v30 = vmax.f32 %v83_v23, -100.0  ;;  %v85_v31 = vmul.f32 0.6931472, %v171_v25 }
  0x37   :  { %v175_v32 = vpop.eup %174  ;;  %v104_v33 = vsel %vm298_vm0, %v88_v26, %v72_v18  ;;  %v74_v34 = vmax.f32 %v69_v28, -100.0  ;;  %v71_v36 = vmul.f32 0.6931472, %v173_v29  ;;  %v96_v54 = vsel %vm298_vm0, %v72_v18, %v88_v26 }
  0x38   :  { %v108_v37 = vmul.f32 1.9048516, %v104_v33  ;;  %v105_v38 = vsel %vm302_vm1, %v89_v30, %v73_v22  ;;  %v90_v41 = vmax.f32 %v85_v31, -100.0  ;;  %v87_v44 = vmul.f32 0.6931472, %v175_v32 }
  0x39   :  { %v109_v40 = vmul.f32 1.9048516, %v105_v38  ;;  %v75_v43 = vmax.f32 %v71_v36, -100.0  ;;  %v97_v55 = vsel %vm302_vm1, %v73_v22, %v89_v30  ;;  %v100_v56 = vsub.f32 0.0, %v96_v54 }
  0x3a   :  { %v112_v42 = vmul.f32 1.442695, %v108_v37  ;;  %v106_v46 = vsel %vm310_vm2, %v90_v41, %v74_v34  ;;  %v91_v49 = vmax.f32 %v87_v44, -100.0  ;;  %v101_v58 = vsub.f32 0.0, %v97_v55 }
  0x3b   :  { %v114_v45 = vmul.f32 1.442695, %v109_v40  ;;  %v110_v48 = vmul.f32 1.9048516, %v106_v46  ;;  %v98_v59 = vsel %vm310_vm2, %v74_v34, %v90_v41 }
  0x3c   :  { %176 = vpow2.f32 %v112_v42  ;;  %v107_v51 = vsel %vm316_vm3, %v91_v49, %v75_v43  ;;  %v102_v0 = vsub.f32 0.0, %v98_v59  ;;  %v99_v1 = vsel %vm316_vm3, %v75_v43, %v91_v49 }
  0x3d   :  { %178 = vpow2.f32 %v114_v45  ;;  %v116_v50 = vmul.f32 1.442695, %v110_v48  ;;  %v111_v52 = vmul.f32 1.9048516, %v107_v51  ;;  %v103_v5 = vsub.f32 0.0, %v99_v1 }
  0x3f   :  { %180 = vpow2.f32 %v116_v50  ;;  %v118_v53 = vmul.f32 1.442695, %v111_v52 }
  0x41   :  { %182 = vpow2.f32 %v118_v53 }
  0x46   :  { %v177_v57 = vpop.eup %176 }
  0x47   :  { %v179_v60 = vpop.eup %178  ;;  %v120_v61 = vmul.f32 0.15780447, %v177_v57 }
  0x48   :  { %v121_v62 = vmul.f32 0.15780447, %v179_v60 }
  0x49   :  { %v124_v63 = vmul.f32 %v120_v61, %v100_v56  ;;  %v181_v2 = vpop.eup %180 }
  0x4a   :  { %v125_v3 = vmul.f32 %v121_v62, %v101_v58  ;;  %v122_v4 = vmul.f32 0.15780447, %v181_v2 }
  0x4b   :  { %v183_v6 = vpop.eup %182  ;;  %136 = vst [vmem:[#allocation7] sm:$0xff] %v124_v63 }
  0x4c   :  { %v126_v7 = vmul.f32 %v122_v4, %v102_v0  ;;  %137 = vst [vmem:[#allocation7 + $0x8] sm:$0xff] %v125_v3  ;;  %v123_v8 = vmul.f32 0.15780447, %v183_v6 }
  0x4e   :  { %v127_v9 = vmul.f32 %v123_v8, %v103_v5  ;;  %138 = vst [vmem:[#allocation7 + $0x10] sm:$0xff] %v126_v7 }
  0x50   :  { %139 = vst [vmem:[#allocation7 + $0x18] sm:$0xff] %v127_v9 }
  0x51   :  { %239 = shalt.err (!%p236_p6)
}
  0x52   :  { %s240_s8 = scalar_lea.hbm %s344_s2, 512 }
  0x53   :  { %p241_p7 = scmp.ne.s32.totalorder %s344_s2, %s240_s8  ;;  %p244_p8 = scmp.lt.u32.totalorder %s240_s8, %s344_s2 }
  0x55   :  { %p246_p9 = pnand %p244_p8, %p241_p7 }
  0x57   :  { %249 = shalt.err (!%p246_p9)
}
  0x58   :  { %149 = dma.vmem_to_hbm [thread:$0]  %s147_s4, 512, %s344_s2, [#allocation4]  }
  0x59   :  { %254 = dma.done.wait [#allocation4], 512  }
  0x5a   :  { %255 = vsyncadd [#allocation4], 4294966784 }
  0x5b   :  { %153 = vsyncpa [#allocation3], 1 }
  0x5c   :  { %154 = vsyncpa [#allocation6], 1 }
  0x5d   :  { %155 = vsyncpa [#allocation4], 1 }

</bundles_post_ra>
